<compile_context>
chip_gen: v5e
topology: v5e:2x2
jax: 0.10.0
libtpu: 0.0.40
codegen_flags: <defaults>
</compile_context>

<pallas_src>
import functools

import jax
import jax.numpy as jnp
from jax import lax
from jax.experimental import pallas as pl
from jax.experimental.pallas import tpu as pltpu

# ---- module hyper-parameters (Adapter(config, input_dim=512, output_dim=256)) ----
CONFIG = {"reduction": 2, "dropout": 0.1, "n_layers": 2}
NUM_CLASSES = 102
FEAT_DIM = 512
HIDDEN = FEAT_DIM // CONFIG["reduction"]        # 256
ADAPTER_OUT = 256
HEAD_PAD = 128                                  # fused head width (102 logits + 1 score + pad)
TB_CAP = 1024                                   # max batch rows per grid step
FEAT_BUDGET_BYTES = 8 * 1024 * 1024             # double-buffered f32 feature-stream budget


def _dual_head_kernel(feat_ref, w1_ref, w2_ref, wh_ref, bh_ref, out_ref, *, num_frames):
    """One batch tile: frame mean, Adapter MLP (w3 folded into heads), fused dual head."""
    # torch.mean(features, dim=1): reduce the flat (tb, F*512) f32 slab with F aligned
    # lane-slice adds (no sublane-padded 3-D block, no full-block temp), scale by 1/F in f32.
    acc = feat_ref[:, 0:FEAT_DIM]
    for f in range(1, num_frames):
        acc = acc + feat_ref[:, f * FEAT_DIM:(f + 1) * FEAT_DIM]
    mean_f = acc * jnp.float32(1.0 / num_frames)                       # (tb, 512) f32

    # Adapter: Linear(512,256,no bias) -> ReLU -> Linear(256,256,no bias) -> ReLU.
    # (Dropout == identity at inference.)  The third Linear(256,256,no bias) is linear with
    # the heads, so it was pre-folded into wh_ref at prep time.
    h = jnp.dot(mean_f.astype(jnp.bfloat16), w1_ref[...],
                preferred_element_type=jnp.float32)
    h = jnp.maximum(h, 0.0)
    h = jnp.dot(h.astype(jnp.bfloat16), w2_ref[...],
                preferred_element_type=jnp.float32)
    h = jnp.maximum(h, 0.0)

    # Fused head (= w3 @ [label_classifier | known_unknown_classifier | 0]):
    # cols [0, 102) = label logits, col 102 = known/unknown score (sigmoid'd), rest zero pad.
    z = jnp.dot(h.astype(jnp.bfloat16), wh_ref[...],
                preferred_element_type=jnp.float32) + bh_ref[...]      # (tb, 128)
    col = lax.broadcasted_iota(jnp.int32, z.shape, 1)
    out_ref[...] = jnp.where(col == NUM_CLASSES, jax.nn.sigmoid(z), z)


def _prep_params(params):
    """Fuse/pad the two heads, fold w3 into the fused head (all in f32), cast weights to bf16."""
    w1 = params["w1"].astype(jnp.bfloat16)                             # (512, 256)
    w2 = params["w2"].astype(jnp.bfloat16)                             # (256, 256)

    wh = jnp.zeros((ADAPTER_OUT, HEAD_PAD), jnp.float32)
    wh = wh.at[:, :NUM_CLASSES].set(params["wl"].astype(jnp.float32))
    wh = wh.at[:, NUM_CLASSES:NUM_CLASSES + 1].set(params["wk"].astype(jnp.float32))
    # No nonlinearity between the adapter's last Linear (w3) and the heads -> fold it in.
    whf = jnp.dot(params["w3"].astype(jnp.float32), wh).astype(jnp.bfloat16)   # (256, 128)

    bh = jnp.zeros((1, HEAD_PAD), jnp.float32)
    bh = bh.at[:, :NUM_CLASSES].set(params["bl"].astype(jnp.float32))
    bh = bh.at[:, NUM_CLASSES:NUM_CLASSES + 1].set(params["bk"].astype(jnp.float32))
    return w1, w2, whf, bh


def _pick_tb(B, F):
    """Batch tile: VMEM- and F-aware, multiple of 8, >= 2 grid steps when the batch allows."""
    if B < 8:
        return B                                   # block dim == full (small) batch dim is legal
    row_bytes = F * FEAT_DIM * 4                   # one flattened f32 feature row
    tb = (FEAT_BUDGET_BYTES // (2 * row_bytes)) // 8 * 8
    tb = max(8, min(tb, TB_CAP))
    tb = min(tb, (B // 8) * 8)                     # first blocks fully in-bounds
    # v7x megacore: keep at least 2 grid steps so the "parallel" axis shards across both TCs.
    if B >= 16 and pl.cdiv(B, tb) < 2:
        tb = max(8, ((B // 2) // 8) * 8)
    return tb


def dual_classifier_heads(frame_features, params):
    """Returns (label logits for all rows (B, 102) f32, known/unknown probabilities (B, 1) f32)."""
    B, F, D = frame_features.shape
    assert D == FEAT_DIM
    w1, w2, whf, bh = _prep_params(params)

    # Free, contiguous reshape: keeps the dominant HBM stream as one dense 2-D f32 slab
    # (no wrapper-side dtype cast pass, no jnp.pad pass).
    feats2d = frame_features.reshape(B, F * FEAT_DIM)

    tb = _pick_tb(B, F)
    grid = (pl.cdiv(B, tb),)

    fused = pl.pallas_call(
        functools.partial(_dual_head_kernel, num_frames=F),
        out_shape=jax.ShapeDtypeStruct((B, HEAD_PAD), jnp.float32),
        grid=grid,
        in_specs=[
            pl.BlockSpec((tb, F * FEAT_DIM), lambda i: (i, 0)),        # streamed per tile
            pl.BlockSpec((FEAT_DIM, HIDDEN), lambda i: (0, 0)),        # weights stay resident
            pl.BlockSpec((HIDDEN, HIDDEN), lambda i: (0, 0)),
            pl.BlockSpec((HIDDEN, HEAD_PAD), lambda i: (0, 0)),
            pl.BlockSpec((1, HEAD_PAD), lambda i: (0, 0)),
        ],
        out_specs=pl.BlockSpec((tb, HEAD_PAD), lambda i: (i, 0)),
        compiler_params=pltpu.CompilerParams(
            dimension_semantics=("parallel",),
            vmem_limit_bytes=32 * 1024 * 1024,
        ),
    )(feats2d, w1, w2, whf, bh)

    labels_all = fused[:, :NUM_CLASSES]                      # (B, 102) logits
    probs = fused[:, NUM_CLASSES:NUM_CLASSES + 1]            # (B, 1), already sigmoid'd
    return labels_all, probs


def forward(frame_features, params, known_unknown_binary_mask=None, mode="Train"):
    """Mirrors DualClassifier_sharedLayer.forward (starting from per-frame features)."""
    labels_all, probs = dual_classifier_heads(frame_features, params)
    known_unknown_labels = (probs >= 0.5).astype(jnp.float32)          # (B, 1)

    if mode == "Train":
        mask = jnp.asarray(known_unknown_binary_mask, dtype=bool)
        known_labels = labels_all[mask]
    elif mode == "Test":
        # Single host pull of the (B,) mask; it is needed anyway for the data-dependent
        # boolean gather, so no extra device->host round trip for the emptiness check.
        mask_host = jax.device_get(known_unknown_labels[:, 0] > 0.5)
        if not bool(mask_host.any()):
            return None, known_unknown_labels
        known_labels = labels_all[jnp.asarray(mask_host)]
    else:
        raise ValueError(mode)

    # label_classifier is row-wise, so computing logits for all rows in-kernel and selecting
    # masked rows afterwards is identical to label_classifier(adapted_features[mask]).
    return known_labels, known_unknown_labels


def init_params(key):
    """Deterministic synthetic parameters (PyTorch Linear weights stored transposed: (in, out))."""
    k = jax.random.split(key, 5)
    s = 0.02
    return {
        "w1": jax.random.normal(k[0], (FEAT_DIM, HIDDEN), jnp.float32) * s,
        "w2": jax.random.normal(k[1], (HIDDEN, HIDDEN), jnp.float32) * s,
        "w3": jax.random.normal(k[2], (HIDDEN, ADAPTER_OUT), jnp.float32) * s,
        "wl": jax.random.normal(k[3], (ADAPTER_OUT, NUM_CLASSES), jnp.float32) * s,
        "bl": jnp.zeros((1, NUM_CLASSES), jnp.float32),
        "wk": jax.random.normal(k[4], (ADAPTER_OUT, 1), jnp.float32) * s,
        "bk": jnp.zeros((1, 1), jnp.float32),
    }


if __name__ == "__main__":
    key = jax.random.PRNGKey(0)
    pkey, fkey = jax.random.split(key)
    params = init_params(pkey)

    B, F = 2, 4  # small batch, 4 frames per clip
    frame_features = jax.random.normal(fkey, (B, F, FEAT_DIM), jnp.float32)
    known_unknown_binary_mask = jnp.array([True, False])

    known_labels, ku_labels = forward(
        frame_features, params,
        known_unknown_binary_mask=known_unknown_binary_mask, mode="Train")
    jax.block_until_ready((known_labels, ku_labels))

    assert known_labels.shape == (1, NUM_CLASSES)
    assert ku_labels.shape == (B, 1)

    # Test mode also exercises the dynamic branch.
    test_labels, test_ku = forward(frame_features, params, mode="Test")
    if test_labels is not None:
        jax.block_until_ready(test_labels)
    jax.block_until_ready(test_ku)

    print("KERNEL_OK")
</pallas_src>

<mosaic_0001>
module attributes {stable_mosaic.version = 11 : i64} {
  func.func @_dual_head_kernel(%arg0: i32, %arg1: memref<2x2048xf32, #tpu.memory_space<vmem>>, %arg2: memref<512x256xbf16, #tpu.memory_space<vmem>>, %arg3: memref<256x256xbf16, #tpu.memory_space<vmem>>, %arg4: memref<256x128xbf16, #tpu.memory_space<vmem>>, %arg5: memref<1x128xf32, #tpu.memory_space<vmem>>, %arg6: memref<2x128xf32, #tpu.memory_space<vmem>>) attributes {dimension_semantics = [#tpu.dimension_semantics<parallel>], iteration_bounds = array<i64: 1>, scalar_prefetch = 0 : i64, scratch_operands = 0 : i64, tpu.core_type = #tpu.core_type<tc>, window_params = [{transform_indices = @transform_0, window_bounds = array<i64: 2, 2048>}, {pipeline_mode = #tpu.pipeline_mode<synchronous>, transform_indices = @transform_1, window_bounds = array<i64: 512, 256>}, {pipeline_mode = #tpu.pipeline_mode<synchronous>, transform_indices = @transform_2, window_bounds = array<i64: 256, 256>}, {pipeline_mode = #tpu.pipeline_mode<synchronous>, transform_indices = @transform_3, window_bounds = array<i64: 256, 128>}, {pipeline_mode = #tpu.pipeline_mode<synchronous>, transform_indices = @transform_4, window_bounds = array<i64: 1, 128>}, {transform_indices = @transform_5, window_bounds = array<i64: 2, 128>}]} {
    %c0 = arith.constant 0 : index
    %c0_0 = arith.constant 0 : index
    %0 = vector.load %arg1[%c0, %c0_0] : memref<2x2048xf32, #tpu.memory_space<vmem>>, vector<2x512xf32>
    %c0_1 = arith.constant 0 : index
    %c512 = arith.constant 512 : index
    %1 = vector.load %arg1[%c0_1, %c512] : memref<2x2048xf32, #tpu.memory_space<vmem>>, vector<2x512xf32>
    %2 = arith.addf %0, %1 : vector<2x512xf32>
    %c0_2 = arith.constant 0 : index
    %c1024 = arith.constant 1024 : index
    %3 = vector.load %arg1[%c0_2, %c1024] : memref<2x2048xf32, #tpu.memory_space<vmem>>, vector<2x512xf32>
    %4 = arith.addf %2, %3 : vector<2x512xf32>
    %c0_3 = arith.constant 0 : index
    %c1536 = arith.constant 1536 : index
    %5 = vector.load %arg1[%c0_3, %c1536] : memref<2x2048xf32, #tpu.memory_space<vmem>>, vector<2x512xf32>
    %6 = arith.addf %4, %5 : vector<2x512xf32>
    %cst = arith.constant 2.500000e-01 : f32
    %7 = vector.broadcast %cst : f32 to vector<2x512xf32>
    %8 = arith.mulf %6, %7 : vector<2x512xf32>
    %9 = arith.truncf %8 : vector<2x512xf32> to vector<2x512xbf16>
    %c0_4 = arith.constant 0 : index
    %c0_5 = arith.constant 0 : index
    %10 = vector.load %arg2[%c0_4, %c0_5] : memref<512x256xbf16, #tpu.memory_space<vmem>>, vector<512x256xbf16>
    %cst_6 = arith.constant dense<0.000000e+00> : vector<2x256xf32>
    %11 = tpu.matmul %9, %10, %cst_6 {dimension_numbers = #tpu.dot_dimension_numbers<[1], [0], [0], [1], [0, 0, 1, 1], [], []>} : vector<2x512xbf16>, vector<512x256xbf16>, vector<2x256xf32> -> vector<2x256xf32>
    %cst_7 = arith.constant 0.000000e+00 : f32
    %12 = vector.broadcast %cst_7 : f32 to vector<2x256xf32>
    %13 = arith.maximumf %11, %12 : vector<2x256xf32>
    %14 = arith.truncf %13 : vector<2x256xf32> to vector<2x256xbf16>
    %c0_8 = arith.constant 0 : index
    %c0_9 = arith.constant 0 : index
    %15 = vector.load %arg3[%c0_8, %c0_9] : memref<256x256xbf16, #tpu.memory_space<vmem>>, vector<256x256xbf16>
    %cst_10 = arith.constant dense<0.000000e+00> : vector<2x256xf32>
    %16 = tpu.matmul %14, %15, %cst_10 {dimension_numbers = #tpu.dot_dimension_numbers<[1], [0], [0], [1], [0, 0, 1, 1], [], []>} : vector<2x256xbf16>, vector<256x256xbf16>, vector<2x256xf32> -> vector<2x256xf32>
    %cst_11 = arith.constant 0.000000e+00 : f32
    %17 = vector.broadcast %cst_11 : f32 to vector<2x256xf32>
    %18 = arith.maximumf %16, %17 : vector<2x256xf32>
    %19 = arith.truncf %18 : vector<2x256xf32> to vector<2x256xbf16>
    %c0_12 = arith.constant 0 : index
    %c0_13 = arith.constant 0 : index
    %20 = vector.load %arg4[%c0_12, %c0_13] : memref<256x128xbf16, #tpu.memory_space<vmem>>, vector<256x128xbf16>
    %cst_14 = arith.constant dense<0.000000e+00> : vector<2x128xf32>
    %21 = tpu.matmul %19, %20, %cst_14 {dimension_numbers = #tpu.dot_dimension_numbers<[1], [0], [0], [1], [0, 0, 1, 1], [], []>} : vector<2x256xbf16>, vector<256x128xbf16>, vector<2x128xf32> -> vector<2x128xf32>
    %c0_15 = arith.constant 0 : index
    %c0_16 = arith.constant 0 : index
    %22 = vector.load %arg5[%c0_15, %c0_16] : memref<1x128xf32, #tpu.memory_space<vmem>>, vector<1x128xf32>
    %23 = vector.broadcast %22 : vector<1x128xf32> to vector<2x128xf32>
    %24 = arith.addf %21, %23 : vector<2x128xf32>
    %25 = tpu.iota {dimensions = array<i32: 1>} : vector<2x128xi32>
    %c102_i32 = arith.constant 102 : i32
    %26 = vector.broadcast %c102_i32 : i32 to vector<2x128xi32>
    %27 = arith.cmpi eq, %25, %26 : vector<2x128xi32>
    %28 = arith.negf %24 : vector<2x128xf32>
    %29 = math.exp %28 : vector<2x128xf32>
    %cst_17 = arith.constant 1.000000e+00 : f32
    %30 = vector.broadcast %cst_17 : f32 to vector<2x128xf32>
    %31 = arith.addf %30, %29 : vector<2x128xf32>
    %32 = arith.divf %30, %31 : vector<2x128xf32>
    %33 = arith.select %27, %32, %24 : vector<2x128xi1>, vector<2x128xf32>
    %c0_18 = arith.constant 0 : index
    %c0_19 = arith.constant 0 : index
    %34 = vector.load %arg6[%c0_18, %c0_19] : memref<2x128xf32, #tpu.memory_space<vmem>>, vector<2x128xf32>
    tpu.vector_store %arg6[%c0_18, %c0_19], %33 {strides = array<i32>} : memref<2x128xf32, #tpu.memory_space<vmem>>, vector<2x128xf32>,
    return
  }
  func.func @transform_0(%arg0: i32) -> (i32, i32) {
    %c0_i32 = arith.constant 0 : i32
    %c0_i32_0 = arith.constant 0 : i32
    return %arg0, %c0_i32 : i32, i32
  }
  func.func @transform_1(%arg0: i32) -> (i32, i32) {
    %c0_i32 = arith.constant 0 : i32
    %c0_i32_0 = arith.constant 0 : i32
    %c0_i32_1 = arith.constant 0 : i32
    return %c0_i32, %c0_i32_0 : i32, i32
  }
  func.func @transform_2(%arg0: i32) -> (i32, i32) {
    %c0_i32 = arith.constant 0 : i32
    %c0_i32_0 = arith.constant 0 : i32
    %c0_i32_1 = arith.constant 0 : i32
    return %c0_i32, %c0_i32_0 : i32, i32
  }
  func.func @transform_3(%arg0: i32) -> (i32, i32) {
    %c0_i32 = arith.constant 0 : i32
    %c0_i32_0 = arith.constant 0 : i32
    %c0_i32_1 = arith.constant 0 : i32
    return %c0_i32, %c0_i32_0 : i32, i32
  }
  func.func @transform_4(%arg0: i32) -> (i32, i32) {
    %c0_i32 = arith.constant 0 : i32
    %c0_i32_0 = arith.constant 0 : i32
    %c0_i32_1 = arith.constant 0 : i32
    return %c0_i32, %c0_i32_0 : i32, i32
  }
  func.func @transform_5(%arg0: i32) -> (i32, i32) {
    %c0_i32 = arith.constant 0 : i32
    %c0_i32_0 = arith.constant 0 : i32
    return %arg0, %c0_i32 : i32, i32
  }
}

</mosaic_0001>

<bundles_post_ra>
// kernel: tpu_custom_call.1
= control target key start
LH: loop header
LB: loop body
LE: loop exit
PB: predicated region body
PF: predicated region fallthrough
CT: control target
= control target key end

     0   :  { %10 = vsyncpa [#allocation3], 0  ;;  %s1821_s0 = inlined_call_operand.hbm [shape: f32[2,2048], index: 0, kind: input, shape index: {}]   ;;  %s1822_s1 = inlined_call_operand.hbm [shape: bf16[512,256], index: 1, kind: input, shape index: {}]   ;;  %s1823_s2 = inlined_call_operand.hbm [shape: bf16[256,256], index: 2, kind: input, shape index: {}]   ;;  %s1824_s3 = inlined_call_operand.hbm [shape: bf16[256,128], index: 3, kind: input, shape index: {}]   ;;  %s1825_s4 = inlined_call_operand.vmem [shape: f32[1,128], index: 4, kind: input, shape index: {}]   ;;  %s1826_s5 = inlined_call_operand.hbm [shape: f32[2,128], index: 5, kind: output, shape index: {}]  }
   0x1   :  { %11 = vsyncpa [#allocation6], 0 }
   0x2   :  { %12 = vsyncpa [#allocation9], 0  ;;  %s29_s20 = sshll.u32 %s1822_s1, 4  ;;  %s30_s20 = int_to_ptr.hbm [resolvable:$true] %s29_s20 }
   0x3   :  { %13 = vsyncpa [#allocation4], 0  ;;  %s1748_s21 = smov [#allocation5]   ;;  %s19_s25 = sshll.u32 %s1821_s0, 4  ;;  %s20_s25 = int_to_ptr.hbm [resolvable:$true] %s19_s25 }
   0x4   :  { %s31_s22 = sshll.u32 %s1748_s21, 4  ;;  %s1749_s26 = smov 128   ;;  %s32_s22 = int_to_ptr.vmem [resolvable:$true] %s31_s22 }
   0x5   :  { %s1750_s27 = smov 8   ;;  %s1751_s28 = smov [#allocation2]  }
   0x6   :  { %37 = dma.hbm_to_vmem [thread:$0]  %s30_s20, 8192, %s32_s22, [#allocation6], %s1749_s26, %s1749_s26, %s1750_s27  }
   0x7   :  { %s21_s29 = sshll.u32 %s1751_s28, 4  ;;  %s42_s7 = sshll.u32 %s1823_s2, 4  ;;  %s22_s29 = int_to_ptr.vmem [resolvable:$true] %s21_s29  ;;  %s43_s7 = int_to_ptr.hbm [resolvable:$true] %s42_s7 }
   0x8   :  { %24 = dma.hbm_to_vmem [thread:$0]  %s20_s25, 512, %s22_s29, [#allocation3]  }
   0x9   :  { %s55_s9 = sshll.u32 %s1824_s3, 4  ;;  %s1752_s10 = smov [#allocation7]   ;;  %s56_s9 = int_to_ptr.hbm [resolvable:$true] %s55_s9 }
   0xa   :  { %s44_s11 = sshll.u32 %s1752_s10, 4  ;;  %s1753_s0 = smov [#allocation8]   ;;  %s45_s11 = int_to_ptr.vmem [resolvable:$true] %s44_s11 }
   0xb   :  { %50 = dma.hbm_to_vmem [thread:$0]  %s43_s7, 4096, %s45_s11, [#allocation6], %s1749_s26, %s1749_s26, %s1750_s27  }
   0xc   :  { %s57_s12 = sshll.u32 %s1753_s0, 4  ;;  %s1754_s13 = smov 64   ;;  %s58_s12 = int_to_ptr.vmem [resolvable:$true] %s57_s12 }
   0xd   :  { %s1755_s14 = smov 4  }
   0xe   :  { %63 = dma.hbm_to_vmem [thread:$0]  %s56_s9, 2048, %s58_s12, [#allocation9], %s1754_s13, %s1754_s13, %s1755_s14  }
   0xf   :  { %1740 = dma.done.wait [#allocation3], 512  }
  0x10   :  { %1741 = vsyncadd [#allocation3], 4294966784 }
  0x11   :  { %1742 = dma.done.wait [#allocation6], 12288  }
  0x12   :  { %1743 = vsyncadd [#allocation6], 4294955008 }
  0x13   :  { %1744 = dma.done.wait [#allocation9], 2048  }
  0x14   :  { %1745 = vsyncadd [#allocation9], 4294965248  ;;  %v1103_v0 = vld [vmem:[#allocation5 + $0x70] sm:$0xf]  ;;  %v1509_v1 = vld [vmem:[#allocation5 + $0x74] sm:$0xf0] }
  0x15   :  { %v1167_v2 = vld [vmem:[#allocation5 + $0xf0] sm:$0xf]  ;;  %v1104_v3 = vor.u32 %v1509_v1, %v1103_v0  ;;  %v1525_v4 = vld [vmem:[#allocation5 + $0xf4] sm:$0xf0]  ;;  %v1095_v11 = vld [vmem:[#allocation5 + $0x60] sm:$0xf] }
  0x16   :  { %v1231_v5 = vld [vmem:[#allocation5 + $0x170] sm:$0xf]  ;;  %v1541_v6 = vld [vmem:[#allocation5 + $0x174] sm:$0xf0]  ;;  %v1168_v7 = vor.u32 %v1525_v4, %v1167_v2  ;;  %v1507_v13 = vld [vmem:[#allocation5 + $0x64] sm:$0xf0] }
  0x17   :  { %v1232_v8 = vor.u32 %v1541_v6, %v1231_v5  ;;  %v1295_v9 = vld [vmem:[#allocation5 + $0x1f0] sm:$0xf]  ;;  %v1557_v10 = vld [vmem:[#allocation5 + $0x1f4] sm:$0xf0]  ;;  %488 = vmatpush.bf16.msra.mxu0 %v1104_v3  ;;  %v1159_v14 = vld [vmem:[#allocation5 + $0xe0] sm:$0xf]  ;;  %v1096_v16 = vor.u32 %v1507_v13, %v1095_v11 }
  0x18   :  { %v1296_v12 = vor.u32 %v1557_v10, %v1295_v9  ;;  %v1523_v15 = vld [vmem:[#allocation5 + $0xe4] sm:$0xf0]  ;;  %501 = vmatpush.bf16.msra.mxu1 %v1168_v7  ;;  %v1223_v18 = vld [vmem:[#allocation5 + $0x160] sm:$0xf]  ;;  %v1087_v23 = vld [vmem:[#allocation5 + $0x50] sm:$0xf] }
  0x19   :  { %514 = vmatpush.bf16.msra.mxu2 %v1232_v8  ;;  %v1160_v17 = vor.u32 %v1523_v15, %v1159_v14  ;;  %v1539_v19 = vld [vmem:[#allocation5 + $0x164] sm:$0xf0]  ;;  %v1287_v20 = vld [vmem:[#allocation5 + $0x1e0] sm:$0xf]  ;;  %v1505_v24 = vld [vmem:[#allocation5 + $0x54] sm:$0xf0] }
  0x1a   :  { %527 = vmatpush.bf16.msra.mxu3 %v1296_v12  ;;  %v1224_v21 = vor.u32 %v1539_v19, %v1223_v18  ;;  %v1555_v22 = vld [vmem:[#allocation5 + $0x1e4] sm:$0xf0]  ;;  %v1151_v26 = vld [vmem:[#allocation5 + $0xd0] sm:$0xf]  ;;  %v1521_v27 = vld [vmem:[#allocation5 + $0xd4] sm:$0xf0]  ;;  %v1088_v29 = vor.u32 %v1505_v24, %v1087_v23 }
  0x1b   :  { %v1288_v25 = vor.u32 %v1555_v22, %v1287_v20  ;;  %v1215_v28 = vld [vmem:[#allocation5 + $0x150] sm:$0xf]  ;;  %489 = vmatpush.bf16.msra.mxu0 %v1096_v16  ;;  %v1537_v30 = vld [vmem:[#allocation5 + $0x154] sm:$0xf0]  ;;  %v1152_v33 = vor.u32 %v1521_v27, %v1151_v26  ;;  %v1079_v35 = vld [vmem:[#allocation5 + $0x40] sm:$0xf] }
  0x1c   :  { %v1279_v31 = vld [vmem:[#allocation5 + $0x1d0] sm:$0xf]  ;;  %v1553_v32 = vld [vmem:[#allocation5 + $0x1d4] sm:$0xf0]  ;;  %502 = vmatpush.bf16.msra.mxu1 %v1160_v17  ;;  %v1216_v34 = vor.u32 %v1537_v30, %v1215_v28  ;;  %v1503_v36 = vld [vmem:[#allocation5 + $0x44] sm:$0xf0] }
  0x1d   :  { %515 = vmatpush.bf16.msra.mxu2 %v1224_v21  ;;  %v1143_v37 = vld [vmem:[#allocation5 + $0xc0] sm:$0xf]  ;;  %v1280_v38 = vor.u32 %v1553_v32, %v1279_v31  ;;  %v1519_v39 = vld [vmem:[#allocation5 + $0xc4] sm:$0xf0]  ;;  %v1080_v44 = vor.u32 %v1503_v36, %v1079_v35  ;;  %v1071_v47 = vld [vmem:[#allocation5 + $0x30] sm:$0xf] }
  0x1e   :  { %528 = vmatpush.bf16.msra.mxu3 %v1288_v25  ;;  %v1207_v40 = vld [vmem:[#allocation5 + $0x140] sm:$0xf]  ;;  %v1535_v41 = vld [vmem:[#allocation5 + $0x144] sm:$0xf0]  ;;  %v1144_v45 = vor.u32 %v1519_v39, %v1143_v37  ;;  %v1501_v48 = vld [vmem:[#allocation5 + $0x34] sm:$0xf0] }
  0x1f   :  { %v1271_v42 = vld [vmem:[#allocation5 + $0x1c0] sm:$0xf]  ;;  %v1551_v43 = vld [vmem:[#allocation5 + $0x1c4] sm:$0xf0]  ;;  %490 = vmatpush.bf16.msra.mxu0 %v1088_v29  ;;  %v1208_v46 = vor.u32 %v1535_v41, %v1207_v40  ;;  %v1135_v49 = vld [vmem:[#allocation5 + $0xb0] sm:$0xf]  ;;  %v1072_v56 = vor.u32 %v1501_v48, %v1071_v47 }
  0x20   :  { %503 = vmatpush.bf16.msra.mxu1 %v1152_v33  ;;  %v1272_v50 = vor.u32 %v1551_v43, %v1271_v42  ;;  %v1517_v51 = vld [vmem:[#allocation5 + $0xb4] sm:$0xf0]  ;;  %v1199_v52 = vld [vmem:[#allocation5 + $0x130] sm:$0xf]  ;;  %v1063_v59 = vld [vmem:[#allocation5 + $0x20] sm:$0xf] }
  0x21   :  { %516 = vmatpush.bf16.msra.mxu2 %v1216_v34  ;;  %v1533_v53 = vld [vmem:[#allocation5 + $0x134] sm:$0xf0]  ;;  %v1263_v54 = vld [vmem:[#allocation5 + $0x1b0] sm:$0xf]  ;;  %v1136_v57 = vor.u32 %v1517_v51, %v1135_v49  ;;  %v1499_v60 = vld [vmem:[#allocation5 + $0x24] sm:$0xf0] }
  0x22   :  { %529 = vmatpush.bf16.msra.mxu3 %v1280_v38  ;;  %v1549_v55 = vld [vmem:[#allocation5 + $0x1b4] sm:$0xf0]  ;;  %v1200_v58 = vor.u32 %v1533_v53, %v1199_v52  ;;  %v1127_v61 = vld [vmem:[#allocation5 + $0xa0] sm:$0xf]  ;;  %v1515_v63 = vld [vmem:[#allocation5 + $0xa4] sm:$0xf0]  ;;  %v1064_v4 = vor.u32 %v1499_v60, %v1063_v59 }
  0x23   :  { %491 = vmatpush.bf16.msra.mxu0 %v1080_v44  ;;  %v1264_v62 = vor.u32 %v1549_v55, %v1263_v54  ;;  %v1191_v0 = vld [vmem:[#allocation5 + $0x120] sm:$0xf]  ;;  %v1531_v1 = vld [vmem:[#allocation5 + $0x124] sm:$0xf0]  ;;  %v1055_v5 = vld [vmem:[#allocation5 + $0x10] sm:$0xf]  ;;  %v1128_v6 = vor.u32 %v1515_v63, %v1127_v61 }
  0x24   :  { %504 = vmatpush.bf16.msra.mxu1 %v1144_v45  ;;  %v1255_v2 = vld [vmem:[#allocation5 + $0x1a0] sm:$0xf]  ;;  %v1547_v3 = vld [vmem:[#allocation5 + $0x1a4] sm:$0xf0]  ;;  %v1192_v7 = vor.u32 %v1531_v1, %v1191_v0  ;;  %v1497_v8 = vld [vmem:[#allocation5 + $0x14] sm:$0xf0] }
  0x25   :  { %517 = vmatpush.bf16.msra.mxu2 %v1208_v46  ;;  %v1119_v9 = vld [vmem:[#allocation5 + $0x90] sm:$0xf]  ;;  %v1513_v10 = vld [vmem:[#allocation5 + $0x94] sm:$0xf0]  ;;  %v1256_v11 = vor.u32 %v1547_v3, %v1255_v2  ;;  %v1047_v16 = vld [vmem:[#allocation5] sm:$0xf]  ;;  %v1056_v18 = vor.u32 %v1497_v8, %v1055_v5 }
  0x26   :  { %530 = vmatpush.bf16.msra.mxu3 %v1272_v50  ;;  %v1183_v12 = vld [vmem:[#allocation5 + $0x110] sm:$0xf]  ;;  %v1529_v13 = vld [vmem:[#allocation5 + $0x114] sm:$0xf0]  ;;  %v1495_v17 = vld [vmem:[#allocation5 + $0x4] sm:$0xf0]  ;;  %v1120_v22 = vor.u32 %v1513_v10, %v1119_v9 }
  0x27   :  { %492 = vmatpush.bf16.msra.mxu0 %v1072_v56  ;;  %v1247_v14 = vld [vmem:[#allocation5 + $0x190] sm:$0xf]  ;;  %v1545_v15 = vld [vmem:[#allocation5 + $0x194] sm:$0xf0]  ;;  %v1111_v19 = vld [vmem:[#allocation5 + $0x80] sm:$0xf]  ;;  %v1184_v23 = vor.u32 %v1529_v13, %v1183_v12  ;;  %v1048_v34 = vor.u32 %v1495_v17, %v1047_v16 }
  0x28   :  { %505 = vmatpush.bf16.msra.mxu1 %v1136_v57  ;;  %v1511_v20 = vld [vmem:[#allocation5 + $0x84] sm:$0xf0]  ;;  %v1175_v21 = vld [vmem:[#allocation5 + $0x100] sm:$0xf]  ;;  %v1248_v27 = vor.u32 %v1545_v15, %v1247_v14  ;;  %v1508_v28 = vld [vmem:[#allocation5 + $0x74] sm:$0xf] }
  0x29   :  { %518 = vmatpush.bf16.msra.mxu2 %v1200_v58  ;;  %v1527_v24 = vld [vmem:[#allocation5 + $0x104] sm:$0xf0]  ;;  %v1239_v25 = vld [vmem:[#allocation5 + $0x180] sm:$0xf]  ;;  %v1105_v29 = vld [vmem:[#allocation5 + $0x78] sm:$0xf0]  ;;  %v1112_v38 = vor.u32 %v1511_v20, %v1111_v19 }
  0x2a   :  { %531 = vmatpush.bf16.msra.mxu3 %v1264_v62  ;;  %v1543_v26 = vld [vmem:[#allocation5 + $0x184] sm:$0xf0]  ;;  %v1524_v30 = vld [vmem:[#allocation5 + $0xf4] sm:$0xf]  ;;  %v1169_v31 = vld [vmem:[#allocation5 + $0xf8] sm:$0xf0]  ;;  %v1176_v39 = vor.u32 %v1527_v24, %v1175_v21  ;;  %v1108_v44 = vor.u32 %v1508_v28, %v1105_v29 }
  0x2b   :  { %493 = vmatpush.bf16.msra.mxu0 %v1064_v4  ;;  %v1540_v32 = vld [vmem:[#allocation5 + $0x174] sm:$0xf]  ;;  %v82_v33 = vld [vmem:[#allocation2] sm:$0xff]  ;;  %v1233_v35 = vld [vmem:[#allocation5 + $0x178] sm:$0xf0]  ;;  %v1240_v43 = vor.u32 %v1543_v26, %v1239_v25  ;;  %v1172_v46 = vor.u32 %v1524_v30, %v1169_v31  ;;  %s1033_s18 = sshll.u32 %s1826_s5, 4  ;;  %s1034_s18 = int_to_ptr.hbm [resolvable:$true] %s1033_s18 }
  0x2c   :  { %506 = vmatpush.bf16.msra.mxu1 %v1128_v6  ;;  %v83_v36 = vld [vmem:[#allocation2 + $0x8] sm:$0xff]  ;;  %v85_v37 = vld [vmem:[#allocation2 + $0x10] sm:$0xff]  ;;  %v1297_v41 = vld [vmem:[#allocation5 + $0x1f8] sm:$0xf0]  ;;  %v1236_v47 = vor.u32 %v1540_v32, %v1233_v35 }
  0x2d   :  { %519 = vmatpush.bf16.msra.mxu2 %v1192_v7  ;;  %v1556_v40 = vld [vmem:[#allocation5 + $0x1f4] sm:$0xf]  ;;  %v84_v42 = vadd.f32 %v83_v36, %v82_v33  ;;  %v87_v45 = vld [vmem:[#allocation2 + $0x18] sm:$0xff]  ;;  %v1506_v48 = vld [vmem:[#allocation5 + $0x64] sm:$0xf] }
  0x2e   :  { %532 = vmatpush.bf16.msra.mxu3 %v1256_v11  ;;  %v1097_v49 = vld [vmem:[#allocation5 + $0x68] sm:$0xf0]  ;;  %v1522_v50 = vld [vmem:[#allocation5 + $0xe4] sm:$0xf]  ;;  %v1300_v52 = vor.u32 %v1556_v40, %v1297_v41  ;;  %v1504_v60 = vld [vmem:[#allocation5 + $0x54] sm:$0xf] }
  0x2f   :  { %494 = vmatpush.bf16.msra.mxu0 %v1056_v18  ;;  %v86_v51 = vadd.f32 %v85_v37, %v84_v42  ;;  %v1161_v53 = vld [vmem:[#allocation5 + $0xe8] sm:$0xf0]  ;;  %v1538_v54 = vld [vmem:[#allocation5 + $0x164] sm:$0xf]  ;;  %v1100_v59 = vor.u32 %v1506_v48, %v1097_v49  ;;  %v1089_v0 = vld [vmem:[#allocation5 + $0x58] sm:$0xf0] }
  0x30   :  { %507 = vmatpush.bf16.msra.mxu1 %v1120_v22  ;;  %v1225_v55 = vld [vmem:[#allocation5 + $0x168] sm:$0xf0]  ;;  %v1554_v56 = vld [vmem:[#allocation5 + $0x1e4] sm:$0xf]  ;;  %v1164_v61 = vor.u32 %v1522_v50, %v1161_v53  ;;  %v1520_v1 = vld [vmem:[#allocation5 + $0xd4] sm:$0xf]  ;;  %v1092_v8 = vor.u32 %v1504_v60, %v1089_v0 }
  0x31   :  { %520 = vmatpush.bf16.msra.mxu2 %v1184_v23  ;;  %v1289_v57 = vld [vmem:[#allocation5 + $0x1e8] sm:$0xf0]  ;;  %v88_v58 = vadd.f32 %v87_v45, %v86_v51  ;;  %v1228_v62 = vor.u32 %v1538_v54, %v1225_v55  ;;  %v1153_v3 = vld [vmem:[#allocation5 + $0xd8] sm:$0xf0]  ;;  %v1536_v4 = vld [vmem:[#allocation5 + $0x154] sm:$0xf] }
  0x32   :  { %533 = vmatpush.bf16.msra.mxu3 %v1248_v27  ;;  %v1292_v2 = vor.u32 %v1554_v56, %v1289_v57  ;;  %v1217_v5 = vld [vmem:[#allocation5 + $0x158] sm:$0xf0]  ;;  %v1552_v6 = vld [vmem:[#allocation5 + $0x1d4] sm:$0xf]  ;;  %v1156_v9 = vor.u32 %v1520_v1, %v1153_v3  ;;  %v1502_v11 = vld [vmem:[#allocation5 + $0x44] sm:$0xf] }
  0x33   :  { %495 = vmatpush.bf16.msra.mxu0 %v1048_v34  ;;  %v89_v63 = vmul.f32 0.25, %v88_v58  ;;  %v1281_v7 = vld [vmem:[#allocation5 + $0x1d8] sm:$0xf0]  ;;  %v1220_v10 = vor.u32 %v1536_v4, %v1217_v5  ;;  %v1081_v12 = vld [vmem:[#allocation5 + $0x48] sm:$0xf0] }
  0x34   :  { %508 = vmatpush.bf16.msra.mxu1 %v1112_v38  ;;  %v1284_v13 = vor.u32 %v1552_v6, %v1281_v7  ;;  %v1518_v14 = vld [vmem:[#allocation5 + $0xc4] sm:$0xf]  ;;  %v1145_v15 = vld [vmem:[#allocation5 + $0xc8] sm:$0xf0]  ;;  %v1084_v16 = vor.u32 %v1502_v11, %v1081_v12  ;;  %v1500_v21 = vld [vmem:[#allocation5 + $0x34] sm:$0xf] }
  0x35   :  { %521 = vmatpush.bf16.msra.mxu2 %v1176_v39  ;;  %91 = vst [vmem:[#allocation1] ss:$4 sm:$0xff] %v89_v63  ;;  %v1534_v17 = vld [vmem:[#allocation5 + $0x144] sm:$0xf]  ;;  %v1209_v18 = vld [vmem:[#allocation5 + $0x148] sm:$0xf0]  ;;  %v1148_v31 = vor.u32 %v1518_v14, %v1145_v15 }
  0x36   :  { %534 = vmatpush.bf16.msra.mxu3 %v1240_v43  ;;  %v1550_v19 = vld [vmem:[#allocation5 + $0x1c4] sm:$0xf]  ;;  %v1273_v20 = vld [vmem:[#allocation5 + $0x1c8] sm:$0xf0]  ;;  %v1073_v22 = vld [vmem:[#allocation5 + $0x38] sm:$0xf0]  ;;  %v1212_v32 = vor.u32 %v1534_v17, %v1209_v18 }
  0x37   :  { %540 = vmatpush.bf16.msrb.mxu0 %v1108_v44  ;;  %v1516_v25 = vld [vmem:[#allocation5 + $0xb4] sm:$0xf]  ;;  %v1137_v26 = vld [vmem:[#allocation5 + $0xb8] sm:$0xf0]  ;;  %v1276_v35 = vor.u32 %v1550_v19, %v1273_v20  ;;  %v1076_v36 = vor.u32 %v1500_v21, %v1073_v22  ;;  %v1498_v41 = vld [vmem:[#allocation5 + $0x24] sm:$0xf] }
  0x38   :  { %553 = vmatpush.bf16.msrb.mxu1 %v1172_v46  ;;  %v1532_v37 = vld [vmem:[#allocation5 + $0x134] sm:$0xf]  ;;  %v1201_v38 = vld [vmem:[#allocation5 + $0x138] sm:$0xf0]  ;;  %v1065_v42 = vld [vmem:[#allocation5 + $0x28] sm:$0xf0]  ;;  %v1140_v43 = vor.u32 %v1516_v25, %v1137_v26 }
  0x39   :  { %566 = vmatpush.bf16.msrb.mxu2 %v1236_v47  ;;  %v1548_v39 = vld [vmem:[#allocation5 + $0x1b4] sm:$0xf]  ;;  %v1265_v40 = vld [vmem:[#allocation5 + $0x1b8] sm:$0xf0]  ;;  %v1204_v44 = vor.u32 %v1532_v37, %v1201_v38  ;;  %v1514_v45 = vld [vmem:[#allocation5 + $0xa4] sm:$0xf]  ;;  %v1068_v48 = vor.u32 %v1498_v41, %v1065_v42 }
  0x3a   :  { %579 = vmatpush.bf16.msrb.mxu3 %v1300_v52  ;;  %v1129_v46 = vld [vmem:[#allocation5 + $0xa8] sm:$0xf0]  ;;  %v1268_v47 = vor.u32 %v1548_v39, %v1265_v40  ;;  %v1530_v49 = vld [vmem:[#allocation5 + $0x124] sm:$0xf]  ;;  %v1496_v53 = vld [vmem:[#allocation5 + $0x14] sm:$0xf] }
  0x3b   :  { %541 = vmatpush.bf16.msrb.mxu0 %v1100_v59  ;;  %v1193_v50 = vld [vmem:[#allocation5 + $0x128] sm:$0xf0]  ;;  %v1546_v51 = vld [vmem:[#allocation5 + $0x1a4] sm:$0xf]  ;;  %v1057_v54 = vld [vmem:[#allocation5 + $0x18] sm:$0xf0]  ;;  %v1132_v55 = vor.u32 %v1514_v45, %v1129_v46 }
  0x3c   :  { %554 = vmatpush.bf16.msrb.mxu1 %v1164_v61  ;;  %v94_v23 = vld.sshfl [vmem:[#allocation1 + $0x10] sm:$0xff pattern:$0x73625140]  ;;  %v95_v24 = vld.sshfl [vmem:[#allocation1 + $0x18] sm:$0xff pattern:$0x73625140]  ;;  %v1196_v56 = vor.u32 %v1530_v49, %v1193_v50  ;;  %v1060_v61 = vor.u32 %v1496_v53, %v1057_v54 }
  0x3d   :  { %567 = vmatpush.bf16.msrb.mxu2 %v1228_v62  ;;  %v1799_v27 = vpack.c.bf16 %v94_v23, %v94_v23  ;;  %v1801_v28 = vpack.c.bf16 %v95_v24, %v95_v24  ;;  %v92_v29 = vld.sshfl [vmem:[#allocation1] sm:$0xff pattern:$0x73625140]  ;;  %v93_v30 = vld.sshfl [vmem:[#allocation1 + $0x8] sm:$0xff pattern:$0x73625140] }
  0x3e   :  { %580 = vmatpush.bf16.msrb.mxu3 %v1292_v2  ;;  %v1803_v33 = vpack.c.bf16 %v92_v29, %v92_v29  ;;  %v1805_v34 = vpack.c.bf16 %v93_v30, %v93_v30  ;;  %v1257_v52 = vld [vmem:[#allocation5 + $0x1a8] sm:$0xf0]  ;;  %v1512_v57 = vld [vmem:[#allocation5 + $0x94] sm:$0xf]  ;;  %v1121_v58 = vld [vmem:[#allocation5 + $0x98] sm:$0xf0] }
  0x3f   :  { %542 = vmatpush.bf16.msrb.mxu0 %v1092_v8  ;;  %522 = vmatmul.bf16.vlgmr.msra.gmra.mxu2 %v1799_v27  ;;  %v1528_v59 = vld [vmem:[#allocation5 + $0x114] sm:$0xf]  ;;  %v1260_v60 = vor.u32 %v1546_v51, %v1257_v52  ;;  %v1185_v62 = vld [vmem:[#allocation5 + $0x118] sm:$0xf0]  ;;  %v1494_v1 = vld [vmem:[#allocation5 + $0x4] sm:$0xf]  ;;  %v1124_v5 = vor.u32 %v1512_v57, %v1121_v58 }
  0x40   :  { %555 = vmatpush.bf16.msrb.mxu1 %v1156_v9  ;;  %535 = vmatmul.bf16.vlgmr.msra.gmra.mxu3 %v1801_v28  ;;  %v1544_v63 = vld [vmem:[#allocation5 + $0x194] sm:$0xf]  ;;  %v1249_v0 = vld [vmem:[#allocation5 + $0x198] sm:$0xf0]  ;;  %v1049_v2 = vld [vmem:[#allocation5 + $0x8] sm:$0xf0]  ;;  %v1188_v6 = vor.u32 %v1528_v59, %v1185_v62 }
  0x41   :  { %568 = vmatpush.bf16.msrb.mxu2 %v1220_v10  ;;  %496 = vmatmul.bf16.vlgmr.msra.gmra.mxu0 %v1803_v33  ;;  %v1359_v3 = vld [vmem:[#allocation7 + $0x70] sm:$0xf]  ;;  %v1573_v4 = vld [vmem:[#allocation7 + $0x74] sm:$0xf0]  ;;  %v1510_v7 = vld [vmem:[#allocation5 + $0x84] sm:$0xf]  ;;  %v1252_v8 = vor.u32 %v1544_v63, %v1249_v0  ;;  %v1052_v9 = vor.u32 %v1494_v1, %v1049_v2 }
  0x42   :  { %581 = vmatpush.bf16.msrb.mxu3 %v1284_v13  ;;  %509 = vmatmul.bf16.vlgmr.msra.gmra.mxu1 %v1805_v34  ;;  %v1113_v10 = vld [vmem:[#allocation5 + $0x88] sm:$0xf0]  ;;  %v1526_v11 = vld [vmem:[#allocation5 + $0x104] sm:$0xf]  ;;  %v1360_v15 = vor.u32 %v1573_v4, %v1359_v3  ;;  %v1361_v17 = vld [vmem:[#allocation7 + $0x78] sm:$0xf0] }
  0x43   :  { %543 = vmatpush.bf16.msrb.mxu0 %v1084_v16  ;;  %v1177_v12 = vld [vmem:[#allocation5 + $0x108] sm:$0xf0]  ;;  %v1542_v13 = vld [vmem:[#allocation5 + $0x184] sm:$0xf]  ;;  %v1572_v16 = vld [vmem:[#allocation7 + $0x74] sm:$0xf]  ;;  %v1116_v20 = vor.u32 %v1510_v7, %v1113_v10 }
  0x44   :  { %556 = vmatpush.bf16.msrb.mxu1 %v1148_v31  ;;  %v1241_v14 = vld [vmem:[#allocation5 + $0x188] sm:$0xf0]  ;;  %v1351_v18 = vld [vmem:[#allocation7 + $0x60] sm:$0xf]  ;;  %v1571_v19 = vld [vmem:[#allocation7 + $0x64] sm:$0xf0]  ;;  %v1180_v21 = vor.u32 %v1526_v11, %v1177_v12  ;;  %v1364_v23 = vor.u32 %v1572_v16, %v1361_v17 }
  0x45   :  { %569 = vmatpush.bf16.msrb.mxu2 %v1212_v32  ;;  %v1244_v22 = vor.u32 %v1542_v13, %v1241_v14  ;;  %v1352_v24 = vor.u32 %v1571_v19, %v1351_v18  ;;  %v1570_v25 = vld [vmem:[#allocation7 + $0x64] sm:$0xf]  ;;  %v1353_v26 = vld [vmem:[#allocation7 + $0x68] sm:$0xf0]  ;;  %v1343_v29 = vld [vmem:[#allocation7 + $0x50] sm:$0xf] }
  0x46   :  { %582 = vmatpush.bf16.msrb.mxu3 %v1276_v35  ;;  %v1569_v30 = vld [vmem:[#allocation7 + $0x54] sm:$0xf0]  ;;  %v1356_v31 = vor.u32 %v1570_v25, %v1353_v26  ;;  %v1568_v35 = vld [vmem:[#allocation7 + $0x54] sm:$0xf]  ;;  %v1335_v37 = vld [vmem:[#allocation7 + $0x40] sm:$0xf] }
  0x47   :  { %544 = vmatpush.bf16.msrb.mxu0 %v1076_v36  ;;  %v1344_v32 = vor.u32 %v1569_v30, %v1343_v29  ;;  %v1345_v36 = vld [vmem:[#allocation7 + $0x58] sm:$0xf0]  ;;  %v1567_v38 = vld [vmem:[#allocation7 + $0x44] sm:$0xf0]  ;;  %v1566_v41 = vld [vmem:[#allocation7 + $0x44] sm:$0xf] }
  0x48   :  { %557 = vmatpush.bf16.msrb.mxu1 %v1140_v43  ;;  %v1348_v39 = vor.u32 %v1568_v35, %v1345_v36  ;;  %v1336_v40 = vor.u32 %v1567_v38, %v1335_v37  ;;  %v1327_v42 = vld [vmem:[#allocation7 + $0x30] sm:$0xf]  ;;  %v1565_v43 = vld [vmem:[#allocation7 + $0x34] sm:$0xf0]  ;;  %v1329_v46 = vld [vmem:[#allocation7 + $0x38] sm:$0xf0] }
  0x49   :  { %570 = vmatpush.bf16.msrb.mxu2 %v1204_v44  ;;  %v1328_v45 = vor.u32 %v1565_v43, %v1327_v42  ;;  %v1321_v50 = vld [vmem:[#allocation7 + $0x28] sm:$0xf0]  ;;  %v1311_v52 = vld [vmem:[#allocation7 + $0x10] sm:$0xf]  ;;  %v1561_v53 = vld [vmem:[#allocation7 + $0x14] sm:$0xf0] }
  0x4a   :  { %583 = vmatpush.bf16.msrb.mxu3 %v1268_v47  ;;  %v1319_v47 = vld [vmem:[#allocation7 + $0x20] sm:$0xf]  ;;  %v1423_v54 = vld [vmem:[#allocation7 + $0xf0] sm:$0xf]  ;;  %v1560_v57 = vld [vmem:[#allocation7 + $0x14] sm:$0xf] }
  0x4b   :  { %545 = vmatpush.bf16.msrb.mxu0 %v1068_v48  ;;  %v1562_v48 = vld [vmem:[#allocation7 + $0x24] sm:$0xf]  ;;  %v1313_v58 = vld [vmem:[#allocation7 + $0x18] sm:$0xf0]  ;;  %v1303_v0 = vld [vmem:[#allocation7] sm:$0xf] }
  0x4c   :  { %558 = vmatpush.bf16.msrb.mxu1 %v1132_v55  ;;  %v1324_v51 = vor.u32 %v1562_v48, %v1321_v50  ;;  %v1312_v55 = vor.u32 %v1561_v53, %v1311_v52  ;;  %v1425_v62 = vld [vmem:[#allocation7 + $0xf8] sm:$0xf0]  ;;  %v1559_v1 = vld [vmem:[#allocation7 + $0x4] sm:$0xf0]  ;;  %v1415_v2 = vld [vmem:[#allocation7 + $0xe0] sm:$0xf] }
  0x4d   :  { %571 = vmatpush.bf16.msrb.mxu2 %v1196_v56  ;;  %v1589_v56 = vld [vmem:[#allocation7 + $0xf4] sm:$0xf0]  ;;  %v1304_v3 = vor.u32 %v1559_v1, %v1303_v0  ;;  %v1587_v4 = vld [vmem:[#allocation7 + $0xe4] sm:$0xf0]  ;;  %v1417_v10 = vld [vmem:[#allocation7 + $0xe8] sm:$0xf0] }
  0x4e   :  { %584 = vmatpush.bf16.msrb.mxu3 %v1260_v60  ;;  %v1424_v59 = vor.u32 %v1589_v56, %v1423_v54  ;;  %v1316_v60 = vor.u32 %v1560_v57, %v1313_v58  ;;  %v1416_v7 = vor.u32 %v1587_v4, %v1415_v2  ;;  %v1407_v12 = vld [vmem:[#allocation7 + $0xd0] sm:$0xf]  ;;  %v1585_v13 = vld [vmem:[#allocation7 + $0xd4] sm:$0xf0]  ;;  %v1584_v14 = vld [vmem:[#allocation7 + $0xd4] sm:$0xf] }
  0x4f   :  { %546 = vmatpush.bf16.msrb.mxu0 %v1060_v61  ;;  %v1588_v61 = vld [vmem:[#allocation7 + $0xf4] sm:$0xf]  ;;  %v1409_v16 = vld [vmem:[#allocation7 + $0xd8] sm:$0xf0]  ;;  %v1399_v18 = vld [vmem:[#allocation7 + $0xc0] sm:$0xf] }
  0x50   :  { %559 = vmatpush.bf16.msrb.mxu1 %v1124_v5  ;;  %v1428_v63 = vor.u32 %v1588_v61, %v1425_v62  ;;  %v1558_v5 = vld [vmem:[#allocation7 + $0x4] sm:$0xf]  ;;  %v1412_v17 = vor.u32 %v1584_v14, %v1409_v16  ;;  %v1583_v19 = vld [vmem:[#allocation7 + $0xc4] sm:$0xf0]  ;;  %v1581_v25 = vld [vmem:[#allocation7 + $0xb4] sm:$0xf0] }
  0x51   :  { %572 = vmatpush.bf16.msrb.mxu2 %v1188_v6  ;;  %v1305_v6 = vld [vmem:[#allocation7 + $0x8] sm:$0xf0]  ;;  %v1580_v26 = vld [vmem:[#allocation7 + $0xb4] sm:$0xf]  ;;  %v1393_v30 = vld [vmem:[#allocation7 + $0xb8] sm:$0xf0] }
  0x52   :  { %585 = vmatpush.bf16.msrb.mxu3 %v1252_v8  ;;  %v1308_v8 = vor.u32 %v1558_v5, %v1305_v6  ;;  %v1396_v35 = vor.u32 %v1580_v26, %v1393_v30  ;;  %v1578_v36 = vld [vmem:[#allocation7 + $0xa4] sm:$0xf]  ;;  %v1385_v37 = vld [vmem:[#allocation7 + $0xa8] sm:$0xf0]  ;;  %v1377_v43 = vld [vmem:[#allocation7 + $0x98] sm:$0xf0] }
  0x53   :  { %547 = vmatpush.bf16.msrb.mxu0 %v1052_v9  ;;  %v1586_v9 = vld [vmem:[#allocation7 + $0xe4] sm:$0xf]  ;;  %v1369_v48 = vld [vmem:[#allocation7 + $0x88] sm:$0xf0]  ;;  %v1604_v14 = vld [vmem:[#allocation8 + $0x70] sm:$0xff] }
  0x54   :  { %560 = vmatpush.bf16.msrb.mxu1 %v1116_v20  ;;  %v1420_v11 = vor.u32 %v1586_v9, %v1417_v10  ;;  %v1582_v20 = vld [vmem:[#allocation7 + $0xc4] sm:$0xf]  ;;  %v1597_v10 = vld [vmem:[#allocation8 + $0x38] sm:$0xff]  ;;  %v1603_v16 = vld [vmem:[#allocation8 + $0x68] sm:$0xff] }
  0x55   :  { %573 = vmatpush.bf16.msrb.mxu2 %v1180_v21  ;;  %v1401_v21 = vld [vmem:[#allocation7 + $0xc8] sm:$0xf0]  ;;  %v1598_v26 = vld [vmem:[#allocation8 + $0x40] sm:$0xff] }
  0x56   :  { %586 = vmatpush.bf16.msrb.mxu3 %v1244_v22  ;;  %548 = vmatmul.bf16.vlgmr.msrb.gmra.mxu0 %v1803_v33  ;;  %v1337_v33 = vld [vmem:[#allocation7 + $0x48] sm:$0xf0]  ;;  %v1400_v22 = vor.u32 %v1583_v19, %v1399_v18  ;;  %v1602_v18 = vld [vmem:[#allocation8 + $0x60] sm:$0xff]  ;;  %v1592_v19 = vld [vmem:[#allocation8 + $0x10] sm:$0xff] }
  0x57   :  { %788 = vmatpush.bf16.msra.mxu0 %v1360_v15  ;;  %561 = vmatmul.bf16.vlgmr.msrb.gmra.mxu1 %v1805_v34  ;;  %v1340_v44 = vor.u32 %v1566_v41, %v1337_v33  ;;  %v1564_v34 = vld [vmem:[#allocation7 + $0x34] sm:$0xf]  ;;  %v1408_v15 = vor.u32 %v1585_v13, %v1407_v12  ;;  %v1577_v41 = vld [vmem:[#allocation7 + $0x94] sm:$0xf0]  ;;  %v1595_v13 = vld [vmem:[#allocation8 + $0x28] sm:$0xff] }
  0x58   :  { %574 = vmatmul.bf16.vlgmr.msrb.gmra.mxu2 %v1799_v27  ;;  %v1332_v27 = vor.u32 %v1564_v34, %v1329_v46  ;;  %801 = vmatpush.bf16.msra.mxu1 %v1424_v59  ;;  %v1576_v33 = vld [vmem:[#allocation7 + $0x94] sm:$0xf]  ;;  %v1367_v46 = vld [vmem:[#allocation7 + $0x80] sm:$0xf]  ;;  %v1605_v12 = vld [vmem:[#allocation8 + $0x78] sm:$0xff] }
  0x59   :  { %814 = vmatpush.bf16.msra.mxu2 %v1364_v23  ;;  %587 = vmatmul.bf16.vlgmr.msrb.gmra.mxu3 %v1801_v28  ;;  %v1563_v28 = vld [vmem:[#allocation7 + $0x24] sm:$0xf0]  ;;  %v1404_v23 = vor.u32 %v1582_v20, %v1401_v21  ;;  %v1601_v20 = vld [vmem:[#allocation8 + $0x58] sm:$0xff] }
  0x5a   :  { %v1320_v49 = vor.u32 %v1563_v28, %v1319_v47  ;;  %827 = vmatpush.bf16.msra.mxu3 %v1428_v63  ;;  %v1574_v47 = vld [vmem:[#allocation7 + $0x84] sm:$0xf]  ;;  %v1591_v21 = vld [vmem:[#allocation8 + $0x8] sm:$0xff] }
  0x5b   :  { %789 = vmatpush.bf16.msra.mxu0 %v1352_v24  ;;  %v1391_v24 = vld [vmem:[#allocation7 + $0xb0] sm:$0xf]  ;;  %v1372_v50 = vor.u32 %v1574_v47, %v1369_v48 }
  0x5c   :  { %802 = vmatpush.bf16.msra.mxu1 %v1416_v7  ;;  %v1392_v29 = vor.u32 %v1581_v25, %v1391_v24  ;;  %v1599_v24 = vld [vmem:[#allocation8 + $0x48] sm:$0xff] }
  0x5d   :  { %815 = vmatpush.bf16.msra.mxu2 %v1356_v31  ;;  %v1383_v31 = vld [vmem:[#allocation7 + $0xa0] sm:$0xf] }
  0x5e   :  { %828 = vmatpush.bf16.msra.mxu3 %v1420_v11  ;;  %v1596_v11 = vld [vmem:[#allocation8 + $0x30] sm:$0xff] }
  0x5f   :  { %790 = vmatpush.bf16.msra.mxu0 %v1344_v32  ;;  %v1579_v32 = vld [vmem:[#allocation7 + $0xa4] sm:$0xf0] }
  0x60   :  { %803 = vmatpush.bf16.msra.mxu1 %v1408_v15  ;;  %v1384_v38 = vor.u32 %v1579_v32, %v1383_v31  ;;  %v1594_v15 = vld [vmem:[#allocation8 + $0x20] sm:$0xff] }
  0x61   :  { %816 = vmatpush.bf16.msra.mxu2 %v1348_v39  ;;  %v1388_v39 = vor.u32 %v1578_v36, %v1385_v37 }
  0x62   :  { %829 = vmatpush.bf16.msra.mxu3 %v1412_v17  ;;  %v1593_v17 = vld [vmem:[#allocation8 + $0x18] sm:$0xff] }
  0x63   :  { %791 = vmatpush.bf16.msra.mxu0 %v1336_v40  ;;  %v1375_v40 = vld [vmem:[#allocation7 + $0x90] sm:$0xf] }
  0x64   :  { %804 = vmatpush.bf16.msra.mxu1 %v1400_v22  ;;  %v1376_v42 = vor.u32 %v1577_v41, %v1375_v40  ;;  %v1600_v22 = vld [vmem:[#allocation8 + $0x50] sm:$0xff] }
  0x65   :  { %817 = vmatpush.bf16.msra.mxu2 %v1340_v44  ;;  %v1380_v44 = vor.u32 %v1576_v33, %v1377_v43 }
  0x66   :  { %830 = vmatpush.bf16.msra.mxu3 %v1404_v23  ;;  %v1590_v23 = vld [vmem:[#allocation8] sm:$0xff] }
  0x67   :  { %792 = vmatpush.bf16.msra.mxu0 %v1328_v45 }
  0x68   :  { %805 = vmatpush.bf16.msra.mxu1 %v1392_v29 }
  0x69   :  { %818 = vmatpush.bf16.msra.mxu2 %v1332_v27  ;;  %v1575_v27 = vld [vmem:[#allocation7 + $0x84] sm:$0xf0] }
  0x6a   :  { %831 = vmatpush.bf16.msra.mxu3 %v1396_v35  ;;  %v1368_v28 = vor.u32 %v1575_v27, %v1367_v46 }
  0x6b   :  { %793 = vmatpush.bf16.msra.mxu0 %v1320_v49 }
  0x6c   :  { %806 = vmatpush.bf16.msra.mxu1 %v1384_v38 }
  0x6d   :  { %819 = vmatpush.bf16.msra.mxu2 %v1324_v51 }
  0x6e   :  { %832 = vmatpush.bf16.msra.mxu3 %v1388_v39 }
  0x6f   :  { %794 = vmatpush.bf16.msra.mxu0 %v1312_v55 }
  0x70   :  { %807 = vmatpush.bf16.msra.mxu1 %v1376_v42 }
  0x71   :  { %820 = vmatpush.bf16.msra.mxu2 %v1316_v60 }
  0x72   :  { %833 = vmatpush.bf16.msra.mxu3 %v1380_v44  ;;  %v1615_v44 = vld [vmem:[%s1825_s4] ss:$0 sm:$0xff]  ;;  %s1756_s4 = smov [#allocation10]  }
  0x73   :  { %795 = vmatpush.bf16.msra.mxu0 %v1304_v3  ;;  %s1031_s15 = sshll.u32 %s1756_s4, 4  ;;  %s1032_s15 = int_to_ptr.vmem [resolvable:$true] %s1031_s15 }
  0x74   :  { %808 = vmatpush.bf16.msra.mxu1 %v1368_v28 }
  0x75   :  { %821 = vmatpush.bf16.msra.mxu2 %v1308_v8 }
  0x76   :  { %834 = vmatpush.bf16.msra.mxu3 %v1372_v50 }
  0x77   :  { %976 = vmatpush.bf16.msrb.mxu0 %v1597_v10 }
  0x78   :  { %989 = vmatpush.bf16.msrb.mxu1 %v1605_v12 }
  0x7b   :  { %977 = vmatpush.bf16.msrb.mxu0 %v1596_v11 }
  0x7c   :  { %990 = vmatpush.bf16.msrb.mxu1 %v1604_v14 }
  0x7f   :  { %978 = vmatpush.bf16.msrb.mxu0 %v1595_v13 }
  0x80   :  { %991 = vmatpush.bf16.msrb.mxu1 %v1603_v16 }
  0x83   :  { %979 = vmatpush.bf16.msrb.mxu0 %v1594_v15 }
  0x84   :  { %992 = vmatpush.bf16.msrb.mxu1 %v1602_v18 }
  0x87   :  { %980 = vmatpush.bf16.msrb.mxu0 %v1593_v17 }
  0x88   :  { %993 = vmatpush.bf16.msrb.mxu1 %v1601_v20 }
  0x8b   :  { %981 = vmatpush.bf16.msrb.mxu0 %v1592_v19 }
  0x8c   :  { %994 = vmatpush.bf16.msrb.mxu1 %v1600_v22 }
  0x8f   :  { %982 = vmatpush.bf16.msrb.mxu0 %v1591_v21 }
  0x90   :  { %995 = vmatpush.bf16.msrb.mxu1 %v1599_v24 }
  0x93   :  { %983 = vmatpush.bf16.msrb.mxu0 %v1590_v23 }
  0x94   :  { %996 = vmatpush.bf16.msrb.mxu1 %v1598_v26 }
  0xbe   :  { %v497_v45 = vpop.f32.mrf.mxu0 }
  0xbf   :  { %v510_v34 = vpop.f32.mrf.mxu1 }
  0xc0   :  { %v511_v49 = vadd.f32 %v510_v34, %v497_v45 }
  0xc2   :  { %v523_v51 = vpop.f32.mrf.mxu2 }
  0xc3   :  { %v536_v52 = vpop.f32.mrf.mxu3  ;;  %v524_v53 = vadd.f32 %v523_v51, %v511_v49  ;;  %v1002_v51 = vlaneseq }
  0xc5   :  { %v537_v54 = vadd.f32 %v536_v52, %v524_v53 }
  0xc6   :  { %v499_v55 = vpop.f32.mrf.mxu0 }
  0xc7   :  { %v512_v56 = vpop.f32.mrf.mxu1  ;;  %v592_v57 = vmax.f32 %v537_v54, 0.0  ;;  %v1003_v54 = vand.u32 127, %v1002_v51 }
  0xc9   :  { %v594_v58 = vpack.c.bf16 %v592_v57, %v592_v57  ;;  %vm1004_vm2 = vcmp.eq.s32.totalorder %v1003_v54, 102 }
  0xca   :  { %v525_v59 = vpop.f32.mrf.mxu2 }
  0xcb   :  { %v538_v60 = vpop.f32.mrf.mxu3  ;;  %796 = vmatmul.bf16.vlgmr.msra.gmra.mxu0 %v594_v58  ;;  %822 = vmatmul.bf16.vlgmr.msra.gmra.mxu2 %v594_v58 }
  0xd3   :  { %v549_v61 = vpop.f32.mrf.mxu0 }
  0xd4   :  { %v562_v62 = vpop.f32.mrf.mxu1 }
  0xd5   :  { %v563_v63 = vadd.f32 %v562_v62, %v549_v61 }
  0xdb   :  { %v575_v0 = vpop.f32.mrf.mxu2  ;;  %v551_v1 = vpop.f32.mrf.mxu0 }
  0xdc   :  { %v576_v2 = vadd.f32 %v575_v0, %v563_v63  ;;  %v588_v3 = vpop.f32.mrf.mxu3  ;;  %v564_v4 = vpop.f32.mrf.mxu1 }
  0xde   :  { %v589_v5 = vadd.f32 %v588_v3, %v576_v2 }
  0xe0   :  { %v593_v6 = vmax.f32 %v589_v5, 0.0 }
  0xe2   :  { %v595_v7 = vpack.c.bf16 %v593_v6, %v593_v6 }
  0xe3   :  { %v577_v8 = vpop.f32.mrf.mxu2 }
  0xe4   :  { %v590_v9 = vpop.f32.mrf.mxu3  ;;  %809 = vmatmul.bf16.vlgmr.msra.gmra.mxu1 %v595_v7  ;;  %835 = vmatmul.bf16.vlgmr.msra.gmra.mxu3 %v595_v7 }
 0x148   :  { %v797_v25 = vpop.f32.mrf.mxu0 }
 0x14e   :  { %v823_v29 = vpop.f32.mrf.mxu2 }
 0x150   :  { %v799_v30 = vpop.f32.mrf.mxu0 }
 0x156   :  { %v825_v31 = vpop.f32.mrf.mxu2 }
 0x161   :  { %v810_v32 = vpop.f32.mrf.mxu1 }
 0x162   :  { %v811_v35 = vadd.f32 %v810_v32, %v797_v25 }
 0x164   :  { %v840_v36 = vmax.f32 %v811_v35, 0.0 }
 0x166   :  { %v842_v37 = vpack.c.bf16 %v840_v36, %v840_v36 }
 0x167   :  { %v836_v38 = vpop.f32.mrf.mxu3 }
 0x168   :  { %v837_v39 = vadd.f32 %v836_v38, %v823_v29  ;;  %984 = vmatmul.bf16.vlgmr.msrb.gmra.mxu0 %v842_v37 }
 0x169   :  { %v812_v40 = vpop.f32.mrf.mxu1 }
 0x16a   :  { %v841_v41 = vmax.f32 %v837_v39, 0.0 }
 0x16c   :  { %v843_v33 = vpack.c.bf16 %v841_v41, %v841_v41 }
 0x16e   :  { %997 = vmatmul.bf16.vlgmr.msrb.gmra.mxu1 %v843_v33 }
 0x16f   :  { %v838_v42 = vpop.f32.mrf.mxu3 }
 0x1e5   :  { %v985_v43 = vpop.f32.mrf.mxu0 }
 0x1e6   :  { %v986_v45 = vadd.f32 %v1615_v44, %v985_v43 }
 0x1eb   :  { %v998_v34 = vpop.f32.mrf.mxu1 }
 0x1ec   :  { %v999_v46 = vadd.f32 %v998_v34, %v986_v45 }
 0x1ed   :  { %v987_v27 = vpop.f32.mrf.mxu0 }
 0x1ee   :  { %v1493_v47 = vmul.f32 -1.442695, %v999_v46 }
 0x1f0   :  { %1616 = vpow2.f32 %v1493_v47 }
 0x1f3   :  { %v1000_v28 = vpop.f32.mrf.mxu1 }
 0x1f6   :  { %v1617_v48 = vpop.eup %1616 }
 0x1f7   :  { %v1008_v49 = vadd.f32 1.0, %v1617_v48 }
 0x1f9   :  { %1618 = vrcp.f32 %v1008_v49  ;;  %v1020_v55 = vand.u32 2147483648, %v1008_v49  ;;  %v1018_v57 = vand.u32 2147483647, %v1008_v49  ;;  %vm1014_vm1 = vweird.f32 %v1008_v49 }
 0x1fb   :  { %v1021_v59 = vor.u32 1.1754944e-38, %v1020_v55  ;;  %vm1019_vm4 = vcmp.eq.f32.partialorder %v1018_v57, 8.507059e+37 }
 0x1ff   :  { %v1619_v50 = vpop.eup %1618 }
 0x200   :  { %v1010_v52 = vmul.f32 %v1619_v50, %v1008_v49  ;;  %vm1015_vm0 = vweird.f32 %v1619_v50 }
 0x201   :  { %vm1016_vm3 = vmor %vm1014_vm1, %vm1015_vm0 }
 0x202   :  { %v1011_v53 = vsub.f32 1.0, %v1010_v52 }
 0x204   :  { %v1012_v56 = vmul.f32 %v1619_v50, %v1011_v53 }
 0x206   :  { %v1013_v58 = vadd.f32 %v1619_v50, %v1012_v56 }
 0x208   :  { %v1017_v60 = vsel %vm1016_vm3, %v1619_v50, %v1013_v58 }
 0x209   :  { %v1022_v61 = vsel %vm1019_vm4, %v1021_v59, %v1017_v60 }
 0x20a   :  { %v1024_v62 = vsel %vm1004_vm2, %v1022_v61, %v999_v46 }
 0x20b   :  { %1025 = vst [vmem:[#allocation10] sm:$0x3] %v1024_v62 }
 0x20c   :  { %1036 = dma.vmem_to_hbm [thread:$0]  %s1032_s15, 32, %s1034_s18, [#allocation4]  }
 0x20d   :  { %1746 = dma.done.wait [#allocation4], 32  }
 0x20e   :  { %1747 = vsyncadd [#allocation4], 4294967264 }
 0x20f   :  { %1041 = vsyncpa [#allocation3], 1 }
 0x210   :  { %1042 = vsyncpa [#allocation6], 1 }
 0x211   :  { %1043 = vsyncpa [#allocation9], 1 }
 0x212   :  { %1044 = vsyncpa [#allocation4], 1 }

</bundles_post_ra>
